<compile_context>
chip_gen: v7x
topology: tpu7x:2x2x1
jax: 0.10.0
libtpu: 0.0.40
codegen_flags: <defaults>
</compile_context>

<pallas_src>
import jax
import jax.numpy as jnp
from jax.experimental import pallas as pl
from jax.experimental.pallas import tpu as pltpu


def _round_up(n: int, m: int) -> int:
    return ((n + m - 1) // m) * m


def _tpu_generation() -> int:
    try:
        kind = jax.devices()[0].device_kind.lower()
    except Exception:
        return 6
    for gen in (7, 6, 5, 4):
        if str(gen) in kind:
            return gen
    return 6


def ner_kernel(x_ref, w1_ref, b1_ref, w2_ref, b2_ref, enc_ref, tag_ref):
    # ---- Encoder: h = tanh(x @ W1 + b1) ----
    # x arrives in its source dtype (no wrapper pre-pass) and is cast to bf16
    # here; the MXU accumulates in f32.
    x = x_ref[...].astype(jnp.bfloat16)                        # (TM, E)
    h = jnp.tanh(
        jnp.dot(x, w1_ref[...], preferred_element_type=jnp.float32)
        + b1_ref[...]
    )                                                          # (TM, H_pad) f32
    # Encoder features (module output #1): stored bf16 -> halves the HBM write.
    enc_ref[...] = h.astype(enc_ref.dtype)

    # ---- Tagger: logits = h @ W2 + b2 ; tags = argmax(logits, -1) ----
    logits = (
        jnp.dot(h.astype(jnp.bfloat16), w2_ref[...],
                preferred_element_type=jnp.float32)
        + b2_ref[...]                                          # padded cols = -1e30
    )                                                          # (TM, T_pad) f32
    tags = jnp.argmax(logits, axis=-1).astype(jnp.int32)       # (TM,)
    # Sublane-dense store: broadcast the tag row over 8 sublanes so the (8, TM)
    # block satisfies the (8, 128) tiling rule and every vst is unmasked.
    tag_ref[...] = jnp.broadcast_to(tags[None, :], tag_ref.shape)


def ner_forward(x, w1, b1, w2, b2, *, tm=None):
    """x: (B, S, E); w1: (E, H); b1: (H,); w2: (H, T); b2: (T,).

    Returns (encoder_features (B, S, H) bf16, tag_ids (B, S) int32)."""
    B, S, E = x.shape
    H = w1.shape[1]
    T = w2.shape[1]
    M = B * S
    gen = _tpu_generation()

    # Row tile: large tiles amortize the ~0.35us per-grid-step overhead; v7x has
    # only 64 MiB/TC of VMEM so it gets the smaller default. Clamp for tiny M.
    if tm is None:
        tm = 1024 if gen >= 7 else 2048
    tm = max(8, min(tm, _round_up(M, 8)))
    num_tiles = pl.cdiv(M, tm)

    # Lane-dense padding of the hidden/tag dims only (multiples of 128).
    H_pad = _round_up(H, 128)
    T_pad = _round_up(T, 128)

    x2d = x.reshape(M, E)                          # free reshape; no pad / cast pass
    w1_p = jnp.pad(w1.astype(jnp.float32),
                   ((0, 0), (0, H_pad - H))).astype(jnp.bfloat16)
    b1_p = jnp.pad(b1.astype(jnp.float32).reshape(1, H),
                   ((0, 0), (0, H_pad - H)))
    w2_p = jnp.pad(w2.astype(jnp.float32),
                   ((0, H_pad - H), (0, T_pad - T))).astype(jnp.bfloat16)
    # Padded tag columns get -1e30 bias so argmax never selects a padding index.
    b2_p = jnp.pad(b2.astype(jnp.float32).reshape(1, T),
                   ((0, 0), (0, T_pad - T)), constant_values=-1e30)

    # VMEM budget from the actual block footprint (weights counted at 2 buffers
    # so the limit also covers the double-buffered fallback), per-gen cap.
    x_item = x2d.dtype.itemsize
    block_bytes = (
        2 * tm * E * x_item                       # x tile, double-buffered
        + 2 * tm * H_pad * 2                      # bf16 encoder tile, double-buffered
        + 2 * 8 * tm * 4                          # tag tile, double-buffered
        + 2 * (E * H_pad * 2 + H_pad * 4 + H_pad * T_pad * 2 + T_pad * 4)
    )
    vmem_cap = (56 if gen >= 7 else 100) * 1024 * 1024
    vmem_limit = int(min(vmem_cap,
                         max(32 * 1024 * 1024, block_bytes + 8 * 1024 * 1024)))

    cost = pl.CostEstimate(
        flops=2 * M * (E * H_pad + H_pad * T_pad),
        transcendentals=M * H_pad,
        bytes_accessed=(M * E * x_item + M * H_pad * 2 + num_tiles * 8 * tm * 4
                        + E * H_pad * 2 + H_pad * 4
                        + H_pad * T_pad * 2 + T_pad * 4),
    )

    def build(single_buffer_weights: bool):
        def w_spec(shape):
            if single_buffer_weights:
                # Constant index_map -> one buffer is enough; halves weight VMEM
                # (each TensorCore holds its own copy under "parallel").
                return pl.BlockSpec(shape, lambda i: (0, 0),
                                    pipeline_mode=pl.Buffered(1))
            return pl.BlockSpec(shape, lambda i: (0, 0))

        return pl.pallas_call(
            ner_kernel,
            out_shape=(
                jax.ShapeDtypeStruct((M, H_pad), jnp.bfloat16),        # enc feats
                jax.ShapeDtypeStruct((num_tiles * 8, tm), jnp.int32),  # tags
            ),
            grid=(num_tiles,),
            in_specs=[
                pl.BlockSpec((tm, E), lambda i: (i, 0)),   # x tile (pipelined)
                w_spec((E, H_pad)),                        # W1 (VMEM resident)
                w_spec((1, H_pad)),                        # b1
                w_spec((H_pad, T_pad)),                    # W2
                w_spec((1, T_pad)),                        # b2
            ],
            out_specs=(
                pl.BlockSpec((tm, H_pad), lambda i: (i, 0)),   # encoder features
                pl.BlockSpec((8, tm), lambda i: (i, 0)),       # sublane-dense tags
            ),
            compiler_params=pltpu.CompilerParams(
                dimension_semantics=("parallel",),
                vmem_limit_bytes=vmem_limit,
            ),
            cost_estimate=cost,
        )

    try:
        enc_pad, tag_pad = build(True)(x2d, w1_p, b1_p, w2_p, b2_p)
        jax.block_until_ready((enc_pad, tag_pad))
    except Exception:
        # Fallback for JAX versions without BlockSpec.pipeline_mode / Buffered(1).
        enc_pad, tag_pad = build(False)(x2d, w1_p, b1_p, w2_p, b2_p)

    # H_pad == H for realistic hidden sizes, so this slice is usually a no-op.
    enc_out = enc_pad[:, :H].reshape(B, S, H)
    tag_ids = (tag_pad.reshape(num_tiles, 8, tm)[:, 0, :]
               .reshape(-1)[:M].reshape(B, S))
    return enc_out, tag_ids


def _reference(x, w1, b1, w2, b2):
    # Same bf16-operand / f32-accumulate numerics as the kernel.
    E = x.shape[-1]
    xb = x.reshape(-1, E).astype(jnp.bfloat16)
    h = jnp.tanh(jnp.dot(xb, w1.astype(jnp.bfloat16),
                         preferred_element_type=jnp.float32) + b1)
    logits = jnp.dot(h.astype(jnp.bfloat16), w2.astype(jnp.bfloat16),
                     preferred_element_type=jnp.float32) + b2
    return h, jnp.argmax(logits, axis=-1).astype(jnp.int32)


if __name__ == "__main__":
    # ---- Case 1: small deterministic demo (single tile) ----
    B, S, E, H, T = 2, 8, 32, 32, 8
    key = jax.random.PRNGKey(0)
    kx, kw1, kb1, kw2, kb2 = jax.random.split(key, 5)
    x = jax.random.normal(kx, (B, S, E), dtype=jnp.float32)
    w1 = jax.random.normal(kw1, (E, H), dtype=jnp.float32) * (1.0 / E ** 0.5)
    b1 = jax.random.normal(kb1, (H,), dtype=jnp.float32) * 0.01
    w2 = jax.random.normal(kw2, (H, T), dtype=jnp.float32) * (1.0 / H ** 0.5)
    b2 = jax.random.normal(kb2, (T,), dtype=jnp.float32) * 0.01

    enc_out, tag_ids = ner_forward(x, w1, b1, w2, b2)
    jax.block_until_ready((enc_out, tag_ids))

    h_ref, tags_ref = _reference(x, w1, b1, w2, b2)
    assert enc_out.shape == (B, S, H) and enc_out.dtype == jnp.bfloat16
    assert tag_ids.shape == (B, S)
    assert jnp.allclose(enc_out.astype(jnp.float32).reshape(-1, H), h_ref,
                        atol=1e-2, rtol=1e-2)
    assert jnp.array_equal(tag_ids.reshape(-1), tags_ref)

    # The PyTorch module returns (tensor, List[List[int]]); expose the same view.
    tag_list = [list(map(int, row)) for row in tag_ids.tolist()]
    assert len(tag_list) == B and len(tag_list[0]) == S

    # ---- Case 2: multi-tile grid + ragged edge block + padded H path ----
    # (this path was flagged as untested in the review; still small: M=400, tm=128)
    B2, S2, E2, H2, T2 = 4, 100, 48, 160, 9
    k2 = jax.random.split(jax.random.PRNGKey(0), 6)[1:]
    x2 = jax.random.normal(k2[0], (B2, S2, E2), dtype=jnp.float32)
    w1_2 = jax.random.normal(k2[1], (E2, H2), dtype=jnp.float32) * (1.0 / E2 ** 0.5)
    b1_2 = jax.random.normal(k2[2], (H2,), dtype=jnp.float32) * 0.01
    w2_2 = jax.random.normal(k2[3], (H2, T2), dtype=jnp.float32) * (1.0 / H2 ** 0.5)
    b2_2 = jax.random.normal(k2[4], (T2,), dtype=jnp.float32) * 0.01

    enc2, tags2 = ner_forward(x2, w1_2, b1_2, w2_2, b2_2, tm=128)
    jax.block_until_ready((enc2, tags2))
    h2_ref, tags2_ref = _reference(x2, w1_2, b1_2, w2_2, b2_2)
    assert enc2.shape == (B2, S2, H2) and tags2.shape == (B2, S2)
    assert jnp.allclose(enc2.astype(jnp.float32).reshape(-1, H2), h2_ref,
                        atol=1e-2, rtol=1e-2)
    assert jnp.array_equal(tags2.reshape(-1), tags2_ref)

    print("KERNEL_OK")
</pallas_src>

<mosaic_0001>
module attributes {stable_mosaic.version = 11 : i64} {
  func.func @ner_kernel(%arg0: i32, %arg1: memref<16x32xf32, #tpu.memory_space<vmem>>, %arg2: memref<32x128xbf16, #tpu.memory_space<vmem>>, %arg3: memref<1x128xf32, #tpu.memory_space<vmem>>, %arg4: memref<128x128xbf16, #tpu.memory_space<vmem>>, %arg5: memref<1x128xf32, #tpu.memory_space<vmem>>, %arg6: memref<16x128xbf16, #tpu.memory_space<vmem>>, %arg7: memref<8x16xi32, #tpu.memory_space<vmem>>) attributes {dimension_semantics = [#tpu.dimension_semantics<parallel>], iteration_bounds = array<i64: 1>, scalar_prefetch = 0 : i64, scratch_operands = 0 : i64, tpu.core_type = #tpu.core_type<tc>, window_params = [{transform_indices = @transform_0, window_bounds = array<i64: 16, 32>}, {pipeline_mode = #tpu.pipeline_mode<synchronous>, transform_indices = @transform_1, window_bounds = array<i64: 32, 128>}, {pipeline_mode = #tpu.pipeline_mode<synchronous>, transform_indices = @transform_2, window_bounds = array<i64: 1, 128>}, {pipeline_mode = #tpu.pipeline_mode<synchronous>, transform_indices = @transform_3, window_bounds = array<i64: 128, 128>}, {pipeline_mode = #tpu.pipeline_mode<synchronous>, transform_indices = @transform_4, window_bounds = array<i64: 1, 128>}, {transform_indices = @transform_5, window_bounds = array<i64: 16, 128>}, {transform_indices = @transform_6, window_bounds = array<i64: 8, 16>}]} {
    %c0 = arith.constant 0 : index
    %c0_0 = arith.constant 0 : index
    %0 = vector.load %arg1[%c0, %c0_0] : memref<16x32xf32, #tpu.memory_space<vmem>>, vector<16x32xf32>
    %1 = arith.truncf %0 : vector<16x32xf32> to vector<16x32xbf16>
    %c0_1 = arith.constant 0 : index
    %c0_2 = arith.constant 0 : index
    %2 = vector.load %arg2[%c0_1, %c0_2] : memref<32x128xbf16, #tpu.memory_space<vmem>>, vector<32x128xbf16>
    %cst = arith.constant dense<0.000000e+00> : vector<16x128xf32>
    %3 = tpu.matmul %1, %2, %cst {dimension_numbers = #tpu.dot_dimension_numbers<[1], [0], [0], [1], [0, 0, 1, 1], [], []>} : vector<16x32xbf16>, vector<32x128xbf16>, vector<16x128xf32> -> vector<16x128xf32>
    %c0_3 = arith.constant 0 : index
    %c0_4 = arith.constant 0 : index
    %4 = vector.load %arg3[%c0_3, %c0_4] : memref<1x128xf32, #tpu.memory_space<vmem>>, vector<1x128xf32>
    %5 = vector.broadcast %4 : vector<1x128xf32> to vector<16x128xf32>
    %6 = arith.addf %3, %5 : vector<16x128xf32>
    %7 = math.tanh %6 : vector<16x128xf32>
    %8 = arith.truncf %7 : vector<16x128xf32> to vector<16x128xbf16>
    %c0_5 = arith.constant 0 : index
    %c0_6 = arith.constant 0 : index
    %9 = vector.load %arg6[%c0_5, %c0_6] : memref<16x128xbf16, #tpu.memory_space<vmem>>, vector<16x128xbf16>
    tpu.vector_store %arg6[%c0_5, %c0_6], %8 {strides = array<i32>} : memref<16x128xbf16, #tpu.memory_space<vmem>>, vector<16x128xbf16>,
    %10 = arith.truncf %7 : vector<16x128xf32> to vector<16x128xbf16>
    %c0_7 = arith.constant 0 : index
    %c0_8 = arith.constant 0 : index
    %11 = vector.load %arg4[%c0_7, %c0_8] : memref<128x128xbf16, #tpu.memory_space<vmem>>, vector<128x128xbf16>
    %cst_9 = arith.constant dense<0.000000e+00> : vector<16x128xf32>
    %12 = tpu.matmul %10, %11, %cst_9 {dimension_numbers = #tpu.dot_dimension_numbers<[1], [0], [0], [1], [0, 0, 1, 1], [], []>} : vector<16x128xbf16>, vector<128x128xbf16>, vector<16x128xf32> -> vector<16x128xf32>
    %c0_10 = arith.constant 0 : index
    %c0_11 = arith.constant 0 : index
    %13 = vector.load %arg5[%c0_10, %c0_11] : memref<1x128xf32, #tpu.memory_space<vmem>>, vector<1x128xf32>
    %14 = vector.broadcast %13 : vector<1x128xf32> to vector<16x128xf32>
    %15 = arith.addf %12, %14 : vector<16x128xf32>
    %16 = tpu.reduce_index %15 {axis = 1 : i32, kind = #tpu.reduction_kind<arg_max>} : vector<16x128xf32> -> vector<16xi32>
    %17 = vector.shape_cast %16 : vector<16xi32> to vector<1x16xi32>
    %18 = vector.shape_cast %17 : vector<1x16xi32> to vector<1x16xi32>
    %19 = vector.broadcast %18 : vector<1x16xi32> to vector<8x16xi32>
    %c0_12 = arith.constant 0 : index
    %c0_13 = arith.constant 0 : index
    %20 = vector.load %arg7[%c0_12, %c0_13] : memref<8x16xi32, #tpu.memory_space<vmem>>, vector<8x16xi32>
    tpu.vector_store %arg7[%c0_12, %c0_13], %19 {strides = array<i32>} : memref<8x16xi32, #tpu.memory_space<vmem>>, vector<8x16xi32>,
    return
  }
  func.func @transform_0(%arg0: i32) -> (i32, i32) {
    %c0_i32 = arith.constant 0 : i32
    %c0_i32_0 = arith.constant 0 : i32
    return %arg0, %c0_i32 : i32, i32
  }
  func.func @transform_1(%arg0: i32) -> (i32, i32) {
    %c0_i32 = arith.constant 0 : i32
    %c0_i32_0 = arith.constant 0 : i32
    %c0_i32_1 = arith.constant 0 : i32
    return %c0_i32, %c0_i32_0 : i32, i32
  }
  func.func @transform_2(%arg0: i32) -> (i32, i32) {
    %c0_i32 = arith.constant 0 : i32
    %c0_i32_0 = arith.constant 0 : i32
    %c0_i32_1 = arith.constant 0 : i32
    return %c0_i32, %c0_i32_0 : i32, i32
  }
  func.func @transform_3(%arg0: i32) -> (i32, i32) {
    %c0_i32 = arith.constant 0 : i32
    %c0_i32_0 = arith.constant 0 : i32
    %c0_i32_1 = arith.constant 0 : i32
    return %c0_i32, %c0_i32_0 : i32, i32
  }
  func.func @transform_4(%arg0: i32) -> (i32, i32) {
    %c0_i32 = arith.constant 0 : i32
    %c0_i32_0 = arith.constant 0 : i32
    %c0_i32_1 = arith.constant 0 : i32
    return %c0_i32, %c0_i32_0 : i32, i32
  }
  func.func @transform_5(%arg0: i32) -> (i32, i32) {
    %c0_i32 = arith.constant 0 : i32
    %c0_i32_0 = arith.constant 0 : i32
    return %arg0, %c0_i32 : i32, i32
  }
  func.func @transform_6(%arg0: i32) -> (i32, i32) {
    %c0_i32 = arith.constant 0 : i32
    %c0_i32_0 = arith.constant 0 : i32
    return %arg0, %c0_i32 : i32, i32
  }
}

module attributes {stable_mosaic.version = 11 : i64} {
  func.func @ner_kernel(%arg0: i32, %arg1: memref<16x32xf32, #tpu.memory_space<vmem>>, %arg2: memref<32x128xbf16, #tpu.memory_space<vmem>>, %arg3: memref<1x128xf32, #tpu.memory_space<vmem>>, %arg4: memref<128x128xbf16, #tpu.memory_space<vmem>>, %arg5: memref<1x128xf32, #tpu.memory_space<vmem>>, %arg6: memref<16x128xbf16, #tpu.memory_space<vmem>>, %arg7: memref<8x16xi32, #tpu.memory_space<vmem>>) attributes {dimension_semantics = [#tpu.dimension_semantics<parallel>], iteration_bounds = array<i64: 1>, scalar_prefetch = 0 : i64, scratch_operands = 0 : i64, tpu.core_type = #tpu.core_type<tc>, window_params = [{transform_indices = @transform_0, window_bounds = array<i64: 16, 32>}, {pipeline_mode = #tpu.pipeline_mode<synchronous>, transform_indices = @transform_1, window_bounds = array<i64: 32, 128>}, {pipeline_mode = #tpu.pipeline_mode<synchronous>, transform_indices = @transform_2, window_bounds = array<i64: 1, 128>}, {pipeline_mode = #tpu.pipeline_mode<synchronous>, transform_indices = @transform_3, window_bounds = array<i64: 128, 128>}, {pipeline_mode = #tpu.pipeline_mode<synchronous>, transform_indices = @transform_4, window_bounds = array<i64: 1, 128>}, {transform_indices = @transform_5, window_bounds = array<i64: 16, 128>}, {transform_indices = @transform_6, window_bounds = array<i64: 8, 16>}]} {
    %c0 = arith.constant 0 : index
    %c0_0 = arith.constant 0 : index
    %0 = vector.load %arg1[%c0, %c0_0] : memref<16x32xf32, #tpu.memory_space<vmem>>, vector<16x32xf32>
    %1 = arith.truncf %0 : vector<16x32xf32> to vector<16x32xbf16>
    %c0_1 = arith.constant 0 : index
    %c0_2 = arith.constant 0 : index
    %2 = vector.load %arg2[%c0_1, %c0_2] : memref<32x128xbf16, #tpu.memory_space<vmem>>, vector<32x128xbf16>
    %cst = arith.constant dense<0.000000e+00> : vector<16x128xf32>
    %3 = tpu.matmul %1, %2, %cst {dimension_numbers = #tpu.dot_dimension_numbers<[1], [0], [0], [1], [0, 0, 1, 1], [], []>} : vector<16x32xbf16>, vector<32x128xbf16>, vector<16x128xf32> -> vector<16x128xf32>
    %c0_3 = arith.constant 0 : index
    %c0_4 = arith.constant 0 : index
    %4 = vector.load %arg3[%c0_3, %c0_4] : memref<1x128xf32, #tpu.memory_space<vmem>>, vector<1x128xf32>
    %5 = vector.broadcast %4 : vector<1x128xf32> to vector<16x128xf32>
    %6 = arith.addf %3, %5 : vector<16x128xf32>
    %7 = math.tanh %6 : vector<16x128xf32>
    %8 = arith.truncf %7 : vector<16x128xf32> to vector<16x128xbf16>
    %c0_5 = arith.constant 0 : index
    %c0_6 = arith.constant 0 : index
    %9 = vector.load %arg6[%c0_5, %c0_6] : memref<16x128xbf16, #tpu.memory_space<vmem>>, vector<16x128xbf16>
    tpu.vector_store %arg6[%c0_5, %c0_6], %8 {strides = array<i32>} : memref<16x128xbf16, #tpu.memory_space<vmem>>, vector<16x128xbf16>,
    %10 = arith.truncf %7 : vector<16x128xf32> to vector<16x128xbf16>
    %c0_7 = arith.constant 0 : index
    %c0_8 = arith.constant 0 : index
    %11 = vector.load %arg4[%c0_7, %c0_8] : memref<128x128xbf16, #tpu.memory_space<vmem>>, vector<128x128xbf16>
    %cst_9 = arith.constant dense<0.000000e+00> : vector<16x128xf32>
    %12 = tpu.matmul %10, %11, %cst_9 {dimension_numbers = #tpu.dot_dimension_numbers<[1], [0], [0], [1], [0, 0, 1, 1], [], []>} : vector<16x128xbf16>, vector<128x128xbf16>, vector<16x128xf32> -> vector<16x128xf32>
    %c0_10 = arith.constant 0 : index
    %c0_11 = arith.constant 0 : index
    %13 = vector.load %arg5[%c0_10, %c0_11] : memref<1x128xf32, #tpu.memory_space<vmem>>, vector<1x128xf32>
    %14 = vector.broadcast %13 : vector<1x128xf32> to vector<16x128xf32>
    %15 = arith.addf %12, %14 : vector<16x128xf32>
    %16 = tpu.reduce_index %15 {axis = 1 : i32, kind = #tpu.reduction_kind<arg_max>} : vector<16x128xf32> -> vector<16xi32>
    %17 = vector.shape_cast %16 : vector<16xi32> to vector<1x16xi32>
    %18 = vector.shape_cast %17 : vector<1x16xi32> to vector<1x16xi32>
    %19 = vector.broadcast %18 : vector<1x16xi32> to vector<8x16xi32>
    %c0_12 = arith.constant 0 : index
    %c0_13 = arith.constant 0 : index
    %20 = vector.load %arg7[%c0_12, %c0_13] : memref<8x16xi32, #tpu.memory_space<vmem>>, vector<8x16xi32>
    tpu.vector_store %arg7[%c0_12, %c0_13], %19 {strides = array<i32>} : memref<8x16xi32, #tpu.memory_space<vmem>>, vector<8x16xi32>,
    return
  }
  func.func @transform_0(%arg0: i32) -> (i32, i32) {
    %c0_i32 = arith.constant 0 : i32
    %c0_i32_0 = arith.constant 0 : i32
    return %arg0, %c0_i32 : i32, i32
  }
  func.func @transform_1(%arg0: i32) -> (i32, i32) {
    %c0_i32 = arith.constant 0 : i32
    %c0_i32_0 = arith.constant 0 : i32
    %c0_i32_1 = arith.constant 0 : i32
    return %c0_i32, %c0_i32_0 : i32, i32
  }
  func.func @transform_2(%arg0: i32) -> (i32, i32) {
    %c0_i32 = arith.constant 0 : i32
    %c0_i32_0 = arith.constant 0 : i32
    %c0_i32_1 = arith.constant 0 : i32
    return %c0_i32, %c0_i32_0 : i32, i32
  }
  func.func @transform_3(%arg0: i32) -> (i32, i32) {
    %c0_i32 = arith.constant 0 : i32
    %c0_i32_0 = arith.constant 0 : i32
    %c0_i32_1 = arith.constant 0 : i32
    return %c0_i32, %c0_i32_0 : i32, i32
  }
  func.func @transform_4(%arg0: i32) -> (i32, i32) {
    %c0_i32 = arith.constant 0 : i32
    %c0_i32_0 = arith.constant 0 : i32
    %c0_i32_1 = arith.constant 0 : i32
    return %c0_i32, %c0_i32_0 : i32, i32
  }
  func.func @transform_5(%arg0: i32) -> (i32, i32) {
    %c0_i32 = arith.constant 0 : i32
    %c0_i32_0 = arith.constant 0 : i32
    return %arg0, %c0_i32 : i32, i32
  }
  func.func @transform_6(%arg0: i32) -> (i32, i32) {
    %c0_i32 = arith.constant 0 : i32
    %c0_i32_0 = arith.constant 0 : i32
    return %arg0, %c0_i32 : i32, i32
  }
}

</mosaic_0001>

<bundles_post_ra>
// kernel: tpu_custom_call.1
= control target key start
LH: loop header
LB: loop body
LE: loop exit
PB: predicated region body
PF: predicated region fallthrough
CT: control target
= control target key end

     0   :  { %12 = vsyncpa [#allocation3], 0  ;;  %s650_s0 = inlined_call_operand.hbm [shape: f32[16,32], index: 0, kind: input, shape index: {}]   ;;  %s651_s1 = inlined_call_operand.hbm [shape: bf16[32,128], index: 1, kind: input, shape index: {}]   ;;  %s652_s2 = inlined_call_operand.vmem [shape: f32[1,128], index: 2, kind: input, shape index: {}]   ;;  %s653_s3 = inlined_call_operand.hbm [shape: bf16[128,128], index: 3, kind: input, shape index: {}]   ;;  %s654_s4 = inlined_call_operand.vmem [shape: f32[1,128], index: 4, kind: input, shape index: {}]   ;;  %s655_s5 = inlined_call_operand.hbm [shape: bf16[16,128], index: 5, kind: output, shape index: {0}]   ;;  %s656_s6 = inlined_call_operand.hbm [shape: s32[8,16], index: 6, kind: output, shape index: {1}]  }
   0x1   :  { %13 = vsyncpa [#allocation6], 0 }
   0x2   :  { %14 = vsyncpa [#allocation4], 0 }
   0x3   :  { %15 = vsyncpa [#allocation10], 0  ;;  %s529_s21 = smov [#allocation5]   ;;  %s411_s25 = scalar_lea.hbm %s651_s1, 256 }
   0x4   :  { %s33_s22 = sshll.u32 %s529_s21, 4  ;;  %p412_p0 = scmp.ne.s32.totalorder %s651_s1, %s411_s25  ;;  %s34_s22 = int_to_ptr.vmem [resolvable:$true] %s33_s22 }
   0x5   :  { %p415_p1 = scmp.lt.u32.totalorder %s411_s25, %s651_s1 }
   0x7   :  { %p417_p2 = pnand %p415_p1, %p412_p0 }
   0x9   :  { %420 = shalt.err (!%p417_p2)
}
   0xa   :  { %s421_s30 = scalar_lea.vmem %s34_s22, 256  ;;  %p426_p4 = scmp.lt.s32.totalorder %s34_s22, %s34_s22 }
   0xb   :  { %p422_p3 = scmp.ne.s32.totalorder %s34_s22, %s421_s30  ;;  %p427_p5 = scmp.lt.s32.totalorder %s421_s30, %s421_s30 }
   0xd   :  { %p428_p6 = por %p427_p5, %p426_p4 }
   0xf   :  { %p429_p7 = pnand %p428_p6, %p422_p3 }
  0x11   :  { %432 = shalt.err (!%p429_p7)
}
  0x12   :  { %s530_s7 = smov 64   ;;  %s531_s8 = smov 4  }
  0x13   :  { %39 = dma.hbm_to_vmem [thread:$0]  %s651_s1, 256, %s34_s22, [#allocation6], %s530_s7, %s530_s7, %s531_s8  }
  0x14   :  { %s532_s11 = smov [#allocation2]   ;;  %s433_s15 = scalar_lea.hbm %s650_s0, 256 }
  0x15   :  { %s21_s12 = sshll.u32 %s532_s11, 4  ;;  %p434_p8 = scmp.ne.s32.totalorder %s650_s0, %s433_s15  ;;  %s22_s12 = int_to_ptr.vmem [resolvable:$true] %s21_s12 }
  0x16   :  { %p437_p9 = scmp.lt.u32.totalorder %s433_s15, %s650_s0 }
  0x18   :  { %p439_p10 = pnand %p437_p9, %p434_p8 }
  0x1a   :  { %442 = shalt.err (!%p439_p10)
}
  0x1b   :  { %s443_s20 = scalar_lea.vmem %s22_s12, 256  ;;  %p448_p12 = scmp.lt.s32.totalorder %s22_s12, %s22_s12 }
  0x1c   :  { %p444_p11 = scmp.ne.s32.totalorder %s22_s12, %s443_s20  ;;  %p449_p13 = scmp.lt.s32.totalorder %s443_s20, %s443_s20 }
  0x1e   :  { %p450_p0 = por %p449_p13, %p448_p12 }
  0x20   :  { %p451_p1 = pnand %p450_p0, %p444_p11 }
  0x22   :  { %454 = shalt.err (!%p451_p1)
}
  0x23   :  { %s533_s1 = smov 128   ;;  %s534_s21 = smov 8  }
  0x24   :  { %27 = dma.hbm_to_vmem [thread:$0]  %s650_s0, 256, %s22_s12, [#allocation3], %s533_s1, %s533_s1, %s534_s21  }
  0x25   :  { %s535_s24 = smov [#allocation7]   ;;  %s455_s28 = scalar_lea.hbm %s653_s3, 1024 }
  0x26   :  { %s47_s25 = sshll.u32 %s535_s24, 4  ;;  %p456_p2 = scmp.ne.s32.totalorder %s653_s3, %s455_s28  ;;  %s48_s25 = int_to_ptr.vmem [resolvable:$true] %s47_s25 }
  0x27   :  { %p459_p3 = scmp.lt.u32.totalorder %s455_s28, %s653_s3 }
  0x29   :  { %p461_p4 = pnand %p459_p3, %p456_p2 }
  0x2b   :  { %464 = shalt.err (!%p461_p4)
}
  0x2c   :  { %s465_s11 = scalar_lea.vmem %s48_s25, 1024  ;;  %p470_p6 = scmp.lt.s32.totalorder %s48_s25, %s48_s25 }
  0x2d   :  { %p466_p5 = scmp.ne.s32.totalorder %s48_s25, %s465_s11  ;;  %p471_p7 = scmp.lt.s32.totalorder %s465_s11, %s465_s11 }
  0x2f   :  { %p472_p8 = por %p471_p7, %p470_p6 }
  0x31   :  { %p473_p9 = pnand %p472_p8, %p466_p5 }
  0x33   :  { %476 = shalt.err (!%p473_p9)
}
  0x34   :  { %53 = dma.hbm_to_vmem [thread:$0]  %s653_s3, 1024, %s48_s25, [#allocation6], %s530_s7, %s530_s7, %s531_s8  }
  0x35   :  { %521 = dma.done.wait [#allocation3], 256  }
  0x36   :  { %522 = vsyncadd [#allocation3], 4294967040 }
  0x37   :  { %523 = dma.done.wait [#allocation6], 1280  }
  0x38   :  { %524 = vsyncadd [#allocation6], 4294966016  ;;  %v536_v0 = vmov 0.0   ;;  %vm537_vm0 = vmmov 0   ;;  %v397_v1 = vld [vmem:[#allocation5] sm:$0xff]   ;;  %v398_v2 = vld [vmem:[#allocation5 + $0x8] sm:$0xff]  }
  0x39   :  { %358 = vmatprep.subr.bf16.mxu0 %v536_v0  ;;  %362 = vmatprep.mubr.msk.bf16.mxu0 %vm537_vm0, %v536_v0  ;;  %v66_v3 = vld [vmem:[#allocation2] sm:$0xff]  ;;  %v67_v4 = vld [vmem:[#allocation2 + $0x8] sm:$0xff]  ;;  %vm92_vm1 = vcmask 261120   ;;  %v401_v8 = vld [vmem:[#allocation7 + $0x10] sm:$0xff]  }
  0x3a   :  { %366 = vmatprep.subr.bf16.mxu1 %v536_v0  ;;  %382 = vmatprep.mubr.msk.bf16.mxu1 %vm537_vm0, %v536_v0  ;;  %v399_v5 = vld [vmem:[#allocation7] sm:$0xff]   ;;  %v68_v6 = vpack.c.bf16 %v67_v4, %v66_v3  ;;  %v400_v7 = vld [vmem:[#allocation7 + $0x8] sm:$0xff]   ;;  %v402_v9 = vld [vmem:[#allocation7 + $0x18] sm:$0xff]  }
  0x3b   :  { %359 = vmatpush3.bf16.msra.mxu0 %v397_v1  ;;  %367 = vmatpush3.bf16.msra.mxu1 %v399_v5  ;;  %v403_v10 = vld [vmem:[#allocation7 + $0x20] sm:$0xff]   ;;  %v404_v11 = vld [vmem:[#allocation7 + $0x28] sm:$0xff]   ;;  %v405_v12 = vld [vmem:[#allocation7 + $0x30] sm:$0xff]  }
  0x3c   :  { %360 = vmatprep.subr.bf16.mxu0 %v536_v0  ;;  %368 = vmatprep.subr.bf16.mxu1 %v536_v0  ;;  %v406_v13 = vld [vmem:[#allocation7 + $0x38] sm:$0xff]   ;;  %v324_v14 = vld [vmem:[%s652_s2] ss:$0 sm:$0xff]  ;;  %s538_s2 = smov [#allocation8]  }
  0x3d   :  { %v330_v24 = vld [vmem:[%s654_s4] ss:$0 sm:$0xff]  ;;  %s297_s16 = sshll.u32 %s538_s2, 4  ;;  %s298_s16 = int_to_ptr.vmem [resolvable:$true] %s297_s16 }
  0x3e   :  { %s477_s17 = scalar_lea.vmem %s298_s16, 128  ;;  %p482_p11 = scmp.lt.s32.totalorder %s298_s16, %s298_s16 }
  0x3f   :  { %361 = vmatpush3.bf16.msra.mxu0 %v398_v2  ;;  %369 = vmatpush3.bf16.msra.mxu1 %v400_v7  ;;  %p478_p10 = scmp.ne.s32.totalorder %s298_s16, %s477_s17  ;;  %p483_p12 = scmp.lt.s32.totalorder %s477_s17, %s477_s17 }
  0x40   :  { %370 = vmatprep.subr.bf16.mxu1 %v536_v0 }
  0x41   :  { %p484_p13 = por %p483_p12, %p482_p11 }
  0x42   :  { %363 = vmatmul.mubr.msk.bf16.vlgmr.msra.gmra.mrb[0].mxu0 %vm92_vm1, %v68_v6 }
  0x43   :  { %371 = vmatpush3.bf16.msra.mxu1 %v401_v8  ;;  %p485_p0 = pnand %p484_p13, %p478_p10 }
  0x44   :  { %372 = vmatprep.subr.bf16.mxu1 %v536_v0 }
  0x47   :  { %373 = vmatpush3.bf16.msra.mxu1 %v402_v9 }
  0x48   :  { %374 = vmatprep.subr.bf16.mxu1 %v536_v0 }
  0x4b   :  { %375 = vmatpush3.bf16.msra.mxu1 %v403_v10 }
  0x4c   :  { %376 = vmatprep.subr.bf16.mxu1 %v536_v0 }
  0x4f   :  { %377 = vmatpush3.bf16.msra.mxu1 %v404_v11 }
  0x50   :  { %378 = vmatprep.subr.bf16.mxu1 %v536_v0 }
  0x53   :  { %379 = vmatpush3.bf16.msra.mxu1 %v405_v12 }
  0x54   :  { %380 = vmatprep.subr.bf16.mxu1 %v536_v0 }
  0x57   :  { %381 = vmatpush3.bf16.msra.mxu1 %v406_v13 }
 0x115   :  { %v130_v15 = vpop.f32.mrb[0].mxu0 }
 0x116   :  { %v131_v16 = vadd.f32 %v324_v14, %v130_v15  ;;  %v364_v17 = vpop.f32.mrb[1].mxu0 }
 0x117   :  { %v133_v18 = vpop.f32.mrb[2].mxu0 }
 0x118   :  { %v134_v19 = vadd.f32 %v324_v14, %v133_v18  ;;  %v365_v20 = vpop.f32.mrb[3].mxu0  ;;  %407 = vtanh.f32 %v131_v16 }
 0x11a   :  { %409 = vtanh.f32 %v134_v19 }
 0x122   :  { %v408_v21 = vpop.eup %407 }
 0x124   :  { %v410_v22 = vpop.eup %409 }
 0x125   :  { %v139_v23 = vpack.c.bf16 %v410_v22, %v408_v21 }
 0x127   :  { %383 = vmatmul.mubr.bf16.vlgmr.msra.gmra.mrb[0].mxu1 %v139_v23  ;;  %345 = vst [vmem:[#allocation8] sm:$0xff] %v139_v23  }
 0x1fa   :  { %v254_v25 = vpop.f32.mrb[0].mxu1 }
 0x1fb   :  { %v384_v26 = vpop.f32.mrb[1].mxu1  ;;  %v255_v27 = vadd.f32 %v330_v24, %v254_v25 }
 0x1fc   :  { %v257_v28 = vpop.f32.mrb[2].mxu1 }
 0x1fd   :  { %261 = vmax.index.xlane.f32.xlu0 %v255_v27  ;;  %v385_v29 = vpop.f32.mrb[3].mxu1  ;;  %v258_v30 = vadd.f32 %v330_v24, %v257_v28 }
 0x201   :  { %263 = vmax.index.xlane.f32.xlu0 %v258_v30 }
 0x202   :  { %488 = shalt.err (!%p485_p0)
}
 0x203   :  { %s489_s19 = scalar_lea.hbm %s655_s5, 128 }
 0x204   :  { %p490_p1 = scmp.ne.s32.totalorder %s655_s5, %s489_s19  ;;  %p493_p2 = scmp.lt.u32.totalorder %s489_s19, %s655_s5 }
 0x206   :  { %p495_p3 = pnand %p493_p2, %p490_p1 }
 0x208   :  { %498 = shalt.err (!%p495_p3)
}
 0x209   :  { %303 = dma.vmem_to_hbm [thread:$0]  %s298_s16, 128, %s655_s5, [#allocation4], %s530_s7, %s530_s7, %s531_s8   ;;  %v265_v31 = vlaneseq  ;;  %vm276_vm2 = vcmask 130112   ;;  %vm290_vm3 = vcmask 130048  }
 0x20a   :  { %s539_s25 = smov [#allocation9]  }
 0x20b   :  { %v266_v32 = vand.u32 127, %v265_v31  ;;  %v268_v33 = vshrl.u32 %v265_v31, 7  ;;  %s310_s26 = sshll.u32 %s539_s25, 4  ;;  %s311_s26 = int_to_ptr.vmem [resolvable:$true] %s310_s26 }
 0x20c   :  { %s499_s27 = scalar_lea.vmem %s311_s26, 128  ;;  %p504_p5 = scmp.lt.s32.totalorder %s311_s26, %s311_s26 }
 0x20d   :  { %v271_v34 = vadd.s32 4294967288, %v266_v32  ;;  %v269_v36 = vsub.s32 %v266_v32, %v268_v33  ;;  %p500_p4 = scmp.ne.s32.totalorder %s311_s26, %s499_s27  ;;  %p505_p6 = scmp.lt.s32.totalorder %s499_s27, %s499_s27 }
 0x20f   :  { %v274_v37 = vsub.s32 %v271_v34, %v268_v33  ;;  %p506_p7 = por %p505_p6, %p504_p5 }
 0x211   :  { %p507_p8 = pnand %p506_p7, %p500_p4 }
 0x28a   :  { %v262_v35 = vpop.xlane.xlu0 %261 }
 0x28b   :  { %v270_v39 = vrot.slane %v262_v35, %v269_v36 }
 0x28e   :  { %v264_v38 = vpop.xlane.xlu0 %263 }
 0x28f   :  { %v275_v40 = vrot.slane %v264_v38, %v274_v37 }
 0x291   :  { %v277_v41 = vsel %vm276_vm2, %v275_v40, %v270_v39 }
 0x292   :  { %291 = vst.msk [vmem:[#allocation9] sm:$0xff] %vm290_vm3, %v277_v41 }
 0x293   :  { %510 = shalt.err (!%p507_p8)
}
 0x294   :  { %s511_s8 = scalar_lea.hbm %s656_s6, 128 }
 0x295   :  { %p512_p9 = scmp.ne.s32.totalorder %s656_s6, %s511_s8  ;;  %p515_p10 = scmp.lt.u32.totalorder %s511_s8, %s656_s6 }
 0x297   :  { %p517_p11 = pnand %p515_p10, %p512_p9 }
 0x299   :  { %520 = shalt.err (!%p517_p11)
}
 0x29a   :  { %313 = dma.vmem_to_hbm [thread:$0]  %s311_s26, 128, %s656_s6, [#allocation10]  }
 0x29b   :  { %525 = dma.done.wait [#allocation4], 128  }
 0x29c   :  { %526 = vsyncadd [#allocation4], 4294967168 }
 0x29d   :  { %527 = dma.done.wait [#allocation10], 128  }
 0x29e   :  { %528 = vsyncadd [#allocation10], 4294967168 }
 0x29f   :  { %320 = vsyncpa [#allocation3], 1 }
 0x2a0   :  { %321 = vsyncpa [#allocation6], 1 }
 0x2a1   :  { %322 = vsyncpa [#allocation4], 1 }
 0x2a2   :  { %323 = vsyncpa [#allocation10], 1 }

// kernel: tpu_custom_call.1
= control target key start
LH: loop header
LB: loop body
LE: loop exit
PB: predicated region body
PF: predicated region fallthrough
CT: control target
= control target key end

     0   :  { %12 = vsyncpa [#allocation3], 0  ;;  %s650_s0 = inlined_call_operand.hbm [shape: f32[16,32], index: 0, kind: input, shape index: {}]   ;;  %s651_s1 = inlined_call_operand.hbm [shape: bf16[32,128], index: 1, kind: input, shape index: {}]   ;;  %s652_s2 = inlined_call_operand.vmem [shape: f32[1,128], index: 2, kind: input, shape index: {}]   ;;  %s653_s3 = inlined_call_operand.hbm [shape: bf16[128,128], index: 3, kind: input, shape index: {}]   ;;  %s654_s4 = inlined_call_operand.vmem [shape: f32[1,128], index: 4, kind: input, shape index: {}]   ;;  %s655_s5 = inlined_call_operand.hbm [shape: bf16[16,128], index: 5, kind: output, shape index: {0}]   ;;  %s656_s6 = inlined_call_operand.hbm [shape: s32[8,16], index: 6, kind: output, shape index: {1}]  }
   0x1   :  { %13 = vsyncpa [#allocation6], 0 }
   0x2   :  { %14 = vsyncpa [#allocation4], 0 }
   0x3   :  { %15 = vsyncpa [#allocation10], 0  ;;  %s529_s21 = smov [#allocation5]   ;;  %s411_s25 = scalar_lea.hbm %s651_s1, 256 }
   0x4   :  { %s33_s22 = sshll.u32 %s529_s21, 4  ;;  %p412_p0 = scmp.ne.s32.totalorder %s651_s1, %s411_s25  ;;  %s34_s22 = int_to_ptr.vmem [resolvable:$true] %s33_s22 }
   0x5   :  { %p415_p1 = scmp.lt.u32.totalorder %s411_s25, %s651_s1 }
   0x7   :  { %p417_p2 = pnand %p415_p1, %p412_p0 }
   0x9   :  { %420 = shalt.err (!%p417_p2)
}
   0xa   :  { %s421_s30 = scalar_lea.vmem %s34_s22, 256  ;;  %p426_p4 = scmp.lt.s32.totalorder %s34_s22, %s34_s22 }
   0xb   :  { %p422_p3 = scmp.ne.s32.totalorder %s34_s22, %s421_s30  ;;  %p427_p5 = scmp.lt.s32.totalorder %s421_s30, %s421_s30 }
   0xd   :  { %p428_p6 = por %p427_p5, %p426_p4 }
   0xf   :  { %p429_p7 = pnand %p428_p6, %p422_p3 }
  0x11   :  { %432 = shalt.err (!%p429_p7)
}
  0x12   :  { %s530_s7 = smov 64   ;;  %s531_s8 = smov 4  }
  0x13   :  { %39 = dma.hbm_to_vmem [thread:$0]  %s651_s1, 256, %s34_s22, [#allocation6], %s530_s7, %s530_s7, %s531_s8  }
  0x14   :  { %s532_s11 = smov [#allocation2]   ;;  %s433_s15 = scalar_lea.hbm %s650_s0, 256 }
  0x15   :  { %s21_s12 = sshll.u32 %s532_s11, 4  ;;  %p434_p8 = scmp.ne.s32.totalorder %s650_s0, %s433_s15  ;;  %s22_s12 = int_to_ptr.vmem [resolvable:$true] %s21_s12 }
  0x16   :  { %p437_p9 = scmp.lt.u32.totalorder %s433_s15, %s650_s0 }
  0x18   :  { %p439_p10 = pnand %p437_p9, %p434_p8 }
  0x1a   :  { %442 = shalt.err (!%p439_p10)
}
  0x1b   :  { %s443_s20 = scalar_lea.vmem %s22_s12, 256  ;;  %p448_p12 = scmp.lt.s32.totalorder %s22_s12, %s22_s12 }
  0x1c   :  { %p444_p11 = scmp.ne.s32.totalorder %s22_s12, %s443_s20  ;;  %p449_p13 = scmp.lt.s32.totalorder %s443_s20, %s443_s20 }
  0x1e   :  { %p450_p0 = por %p449_p13, %p448_p12 }
  0x20   :  { %p451_p1 = pnand %p450_p0, %p444_p11 }
  0x22   :  { %454 = shalt.err (!%p451_p1)
}
  0x23   :  { %s533_s1 = smov 128   ;;  %s534_s21 = smov 8  }
  0x24   :  { %27 = dma.hbm_to_vmem [thread:$0]  %s650_s0, 256, %s22_s12, [#allocation3], %s533_s1, %s533_s1, %s534_s21  }
  0x25   :  { %s535_s24 = smov [#allocation7]   ;;  %s455_s28 = scalar_lea.hbm %s653_s3, 1024 }
  0x26   :  { %s47_s25 = sshll.u32 %s535_s24, 4  ;;  %p456_p2 = scmp.ne.s32.totalorder %s653_s3, %s455_s28  ;;  %s48_s25 = int_to_ptr.vmem [resolvable:$true] %s47_s25 }
  0x27   :  { %p459_p3 = scmp.lt.u32.totalorder %s455_s28, %s653_s3 }
  0x29   :  { %p461_p4 = pnand %p459_p3, %p456_p2 }
  0x2b   :  { %464 = shalt.err (!%p461_p4)
}
  0x2c   :  { %s465_s11 = scalar_lea.vmem %s48_s25, 1024  ;;  %p470_p6 = scmp.lt.s32.totalorder %s48_s25, %s48_s25 }
  0x2d   :  { %p466_p5 = scmp.ne.s32.totalorder %s48_s25, %s465_s11  ;;  %p471_p7 = scmp.lt.s32.totalorder %s465_s11, %s465_s11 }
  0x2f   :  { %p472_p8 = por %p471_p7, %p470_p6 }
  0x31   :  { %p473_p9 = pnand %p472_p8, %p466_p5 }
  0x33   :  { %476 = shalt.err (!%p473_p9)
}
  0x34   :  { %53 = dma.hbm_to_vmem [thread:$0]  %s653_s3, 1024, %s48_s25, [#allocation6], %s530_s7, %s530_s7, %s531_s8  }
  0x35   :  { %521 = dma.done.wait [#allocation3], 256  }
  0x36   :  { %522 = vsyncadd [#allocation3], 4294967040 }
  0x37   :  { %523 = dma.done.wait [#allocation6], 1280  }
  0x38   :  { %524 = vsyncadd [#allocation6], 4294966016  ;;  %v536_v0 = vmov 0.0   ;;  %vm537_vm0 = vmmov 0   ;;  %v397_v1 = vld [vmem:[#allocation5] sm:$0xff]   ;;  %v398_v2 = vld [vmem:[#allocation5 + $0x8] sm:$0xff]  }
  0x39   :  { %358 = vmatprep.subr.bf16.mxu0 %v536_v0  ;;  %362 = vmatprep.mubr.msk.bf16.mxu0 %vm537_vm0, %v536_v0  ;;  %v66_v3 = vld [vmem:[#allocation2] sm:$0xff]  ;;  %v67_v4 = vld [vmem:[#allocation2 + $0x8] sm:$0xff]  ;;  %vm92_vm1 = vcmask 261120   ;;  %v401_v8 = vld [vmem:[#allocation7 + $0x10] sm:$0xff]  }
  0x3a   :  { %366 = vmatprep.subr.bf16.mxu1 %v536_v0  ;;  %382 = vmatprep.mubr.msk.bf16.mxu1 %vm537_vm0, %v536_v0  ;;  %v399_v5 = vld [vmem:[#allocation7] sm:$0xff]   ;;  %v68_v6 = vpack.c.bf16 %v67_v4, %v66_v3  ;;  %v400_v7 = vld [vmem:[#allocation7 + $0x8] sm:$0xff]   ;;  %v402_v9 = vld [vmem:[#allocation7 + $0x18] sm:$0xff]  }
  0x3b   :  { %359 = vmatpush3.bf16.msra.mxu0 %v397_v1  ;;  %367 = vmatpush3.bf16.msra.mxu1 %v399_v5  ;;  %v403_v10 = vld [vmem:[#allocation7 + $0x20] sm:$0xff]   ;;  %v404_v11 = vld [vmem:[#allocation7 + $0x28] sm:$0xff]   ;;  %v405_v12 = vld [vmem:[#allocation7 + $0x30] sm:$0xff]  }
  0x3c   :  { %360 = vmatprep.subr.bf16.mxu0 %v536_v0  ;;  %368 = vmatprep.subr.bf16.mxu1 %v536_v0  ;;  %v406_v13 = vld [vmem:[#allocation7 + $0x38] sm:$0xff]   ;;  %v324_v14 = vld [vmem:[%s652_s2] ss:$0 sm:$0xff]  ;;  %s538_s2 = smov [#allocation8]  }
  0x3d   :  { %v330_v24 = vld [vmem:[%s654_s4] ss:$0 sm:$0xff]  ;;  %s297_s16 = sshll.u32 %s538_s2, 4  ;;  %s298_s16 = int_to_ptr.vmem [resolvable:$true] %s297_s16 }
  0x3e   :  { %s477_s17 = scalar_lea.vmem %s298_s16, 128  ;;  %p482_p11 = scmp.lt.s32.totalorder %s298_s16, %s298_s16 }
  0x3f   :  { %361 = vmatpush3.bf16.msra.mxu0 %v398_v2  ;;  %369 = vmatpush3.bf16.msra.mxu1 %v400_v7  ;;  %p478_p10 = scmp.ne.s32.totalorder %s298_s16, %s477_s17  ;;  %p483_p12 = scmp.lt.s32.totalorder %s477_s17, %s477_s17 }
  0x40   :  { %370 = vmatprep.subr.bf16.mxu1 %v536_v0 }
  0x41   :  { %p484_p13 = por %p483_p12, %p482_p11 }
  0x42   :  { %363 = vmatmul.mubr.msk.bf16.vlgmr.msra.gmra.mrb[0].mxu0 %vm92_vm1, %v68_v6 }
  0x43   :  { %371 = vmatpush3.bf16.msra.mxu1 %v401_v8  ;;  %p485_p0 = pnand %p484_p13, %p478_p10 }
  0x44   :  { %372 = vmatprep.subr.bf16.mxu1 %v536_v0 }
  0x47   :  { %373 = vmatpush3.bf16.msra.mxu1 %v402_v9 }
  0x48   :  { %374 = vmatprep.subr.bf16.mxu1 %v536_v0 }
  0x4b   :  { %375 = vmatpush3.bf16.msra.mxu1 %v403_v10 }
  0x4c   :  { %376 = vmatprep.subr.bf16.mxu1 %v536_v0 }
  0x4f   :  { %377 = vmatpush3.bf16.msra.mxu1 %v404_v11 }
  0x50   :  { %378 = vmatprep.subr.bf16.mxu1 %v536_v0 }
  0x53   :  { %379 = vmatpush3.bf16.msra.mxu1 %v405_v12 }
  0x54   :  { %380 = vmatprep.subr.bf16.mxu1 %v536_v0 }
  0x57   :  { %381 = vmatpush3.bf16.msra.mxu1 %v406_v13 }
 0x115   :  { %v130_v15 = vpop.f32.mrb[0].mxu0 }
 0x116   :  { %v131_v16 = vadd.f32 %v324_v14, %v130_v15  ;;  %v364_v17 = vpop.f32.mrb[1].mxu0 }
 0x117   :  { %v133_v18 = vpop.f32.mrb[2].mxu0 }
 0x118   :  { %v134_v19 = vadd.f32 %v324_v14, %v133_v18  ;;  %v365_v20 = vpop.f32.mrb[3].mxu0  ;;  %407 = vtanh.f32 %v131_v16 }
 0x11a   :  { %409 = vtanh.f32 %v134_v19 }
 0x122   :  { %v408_v21 = vpop.eup %407 }
 0x124   :  { %v410_v22 = vpop.eup %409 }
 0x125   :  { %v139_v23 = vpack.c.bf16 %v410_v22, %v408_v21 }
 0x127   :  { %383 = vmatmul.mubr.bf16.vlgmr.msra.gmra.mrb[0].mxu1 %v139_v23  ;;  %345 = vst [vmem:[#allocation8] sm:$0xff] %v139_v23  }
 0x1fa   :  { %v254_v25 = vpop.f32.mrb[0].mxu1 }
 0x1fb   :  { %v384_v26 = vpop.f32.mrb[1].mxu1  ;;  %v255_v27 = vadd.f32 %v330_v24, %v254_v25 }
 0x1fc   :  { %v257_v28 = vpop.f32.mrb[2].mxu1 }
 0x1fd   :  { %261 = vmax.index.xlane.f32.xlu0 %v255_v27  ;;  %v385_v29 = vpop.f32.mrb[3].mxu1  ;;  %v258_v30 = vadd.f32 %v330_v24, %v257_v28 }
 0x201   :  { %263 = vmax.index.xlane.f32.xlu0 %v258_v30 }
 0x202   :  { %488 = shalt.err (!%p485_p0)
}
 0x203   :  { %s489_s19 = scalar_lea.hbm %s655_s5, 128 }
 0x204   :  { %p490_p1 = scmp.ne.s32.totalorder %s655_s5, %s489_s19  ;;  %p493_p2 = scmp.lt.u32.totalorder %s489_s19, %s655_s5 }
 0x206   :  { %p495_p3 = pnand %p493_p2, %p490_p1 }
 0x208   :  { %498 = shalt.err (!%p495_p3)
}
 0x209   :  { %303 = dma.vmem_to_hbm [thread:$0]  %s298_s16, 128, %s655_s5, [#allocation4], %s530_s7, %s530_s7, %s531_s8   ;;  %v265_v31 = vlaneseq  ;;  %vm276_vm2 = vcmask 130112   ;;  %vm290_vm3 = vcmask 130048  }
 0x20a   :  { %s539_s25 = smov [#allocation9]  }
 0x20b   :  { %v266_v32 = vand.u32 127, %v265_v31  ;;  %v268_v33 = vshrl.u32 %v265_v31, 7  ;;  %s310_s26 = sshll.u32 %s539_s25, 4  ;;  %s311_s26 = int_to_ptr.vmem [resolvable:$true] %s310_s26 }
 0x20c   :  { %s499_s27 = scalar_lea.vmem %s311_s26, 128  ;;  %p504_p5 = scmp.lt.s32.totalorder %s311_s26, %s311_s26 }
 0x20d   :  { %v271_v34 = vadd.s32 4294967288, %v266_v32  ;;  %v269_v36 = vsub.s32 %v266_v32, %v268_v33  ;;  %p500_p4 = scmp.ne.s32.totalorder %s311_s26, %s499_s27  ;;  %p505_p6 = scmp.lt.s32.totalorder %s499_s27, %s499_s27 }
 0x20f   :  { %v274_v37 = vsub.s32 %v271_v34, %v268_v33  ;;  %p506_p7 = por %p505_p6, %p504_p5 }
 0x211   :  { %p507_p8 = pnand %p506_p7, %p500_p4 }
 0x28a   :  { %v262_v35 = vpop.xlane.xlu0 %261 }
 0x28b   :  { %v270_v39 = vrot.slane %v262_v35, %v269_v36 }
 0x28e   :  { %v264_v38 = vpop.xlane.xlu0 %263 }
 0x28f   :  { %v275_v40 = vrot.slane %v264_v38, %v274_v37 }
 0x291   :  { %v277_v41 = vsel %vm276_vm2, %v275_v40, %v270_v39 }
 0x292   :  { %291 = vst.msk [vmem:[#allocation9] sm:$0xff] %vm290_vm3, %v277_v41 }
 0x293   :  { %510 = shalt.err (!%p507_p8)
}
 0x294   :  { %s511_s8 = scalar_lea.hbm %s656_s6, 128 }
 0x295   :  { %p512_p9 = scmp.ne.s32.totalorder %s656_s6, %s511_s8  ;;  %p515_p10 = scmp.lt.u32.totalorder %s511_s8, %s656_s6 }
 0x297   :  { %p517_p11 = pnand %p515_p10, %p512_p9 }
 0x299   :  { %520 = shalt.err (!%p517_p11)
}
 0x29a   :  { %313 = dma.vmem_to_hbm [thread:$0]  %s311_s26, 128, %s656_s6, [#allocation10]  }
 0x29b   :  { %525 = dma.done.wait [#allocation4], 128  }
 0x29c   :  { %526 = vsyncadd [#allocation4], 4294967168 }
 0x29d   :  { %527 = dma.done.wait [#allocation10], 128  }
 0x29e   :  { %528 = vsyncadd [#allocation10], 4294967168 }
 0x29f   :  { %320 = vsyncpa [#allocation3], 1 }
 0x2a0   :  { %321 = vsyncpa [#allocation6], 1 }
 0x2a1   :  { %322 = vsyncpa [#allocation4], 1 }
 0x2a2   :  { %323 = vsyncpa [#allocation10], 1 }

</bundles_post_ra>
